<compile_context>
chip_gen: v7x
topology: tpu7x:2x2x1
jax: 0.10.0
libtpu: 0.0.40
codegen_flags: <defaults>
</compile_context>

<pallas_src>
import functools
import math

import jax
import jax.numpy as jnp
from jax.experimental import pallas as pl
from jax.experimental.pallas import tpu as pltpu

_LANES = 128          # vreg lane width
_SUBLANES = 8         # vreg sublane height
_BLOCK_ROWS_CAP = 2048  # 2048 x 128 x 4B = 1 MiB per output block (2 MiB double-buffered)


def _cdiv(a: int, b: int) -> int:
    return -(-a // b)


def _round_up(x: int, m: int) -> int:
    return _cdiv(x, m) * m


def _pe_kernel(scale_ref, phase_ref, out_ref):
    """out[r, c] = sin((row_base + r) * scale[c] + phase[c]).

    `scale` / `phase` are precomputed (1, cols) rows holding the exp(...) factor,
    the cos pi/2 phase shift and (for the flat layout) the lane->position folding,
    so the kernel body is a single FMA plus one EUP sin per element.
    """
    block_rows = out_ref.shape[0]
    base = (pl.program_id(0) * block_rows).astype(jnp.float32)
    row = base + jax.lax.broadcasted_iota(jnp.int32, out_ref.shape, 0).astype(jnp.float32)
    out_ref[...] = jnp.sin(row * scale_ref[...] + phase_ref[...])


def _scale_phase_natural(d_model: int):
    """Per-feature-column scale/phase rows for the natural (max_len, d_model) layout."""
    j = jnp.arange(d_model, dtype=jnp.int32)
    half = j % 2                                   # 0 -> sin column, 1 -> cos column
    pair2 = (j - half).astype(jnp.float32)         # 2 * (j // 2), matches arange(0, d, 2)
    div_term = jnp.exp(pair2 * (-(math.log(10000.0) / d_model)))
    scale = div_term
    phase = half.astype(jnp.float32) * (math.pi * 0.5)
    return scale[None, :], phase[None, :]          # (1, d_model) each


def _scale_phase_flat(d_model: int):
    """Per-lane scale/phase rows for the lane-dense flat (rows, 128) layout.

    Requires 128 % d_model == 0.  Flat element (global_row, lane) corresponds to
    position = global_row * (128 // d_model) + lane // d_model and feature lane % d_model;
    both lane-dependent terms are folded into scale/phase so the kernel stays a pure FMA.
    """
    m = _LANES // d_model                          # positions per 128-lane output row
    lane = jnp.arange(_LANES, dtype=jnp.int32)
    j = lane % d_model
    half = j % 2
    pair2 = (j - half).astype(jnp.float32)
    div_term = jnp.exp(pair2 * (-(math.log(10000.0) / d_model)))
    lane_pos = (lane // d_model).astype(jnp.float32)
    scale = div_term * float(m)
    phase = lane_pos * div_term + half.astype(jnp.float32) * (math.pi * 0.5)
    return scale[None, :], phase[None, :]          # (1, 128) each


@functools.lru_cache(maxsize=None)
def make_positional_embedding_table(d_model: int, max_len: int = 100) -> jnp.ndarray:
    """Builds (and caches, like register_buffer) the (1, max_len, d_model) PE table."""
    # Same implicit constraint as the PyTorch module (odd d_model would error there too).
    assert d_model % 2 == 0, "d_model must be even (same constraint as the PyTorch module)"
    assert max_len < (1 << 24), "positions must stay exactly representable in float32"

    flat_layout = (d_model < _LANES) and (_LANES % d_model == 0)
    if flat_layout:
        # Lane-dense flat slab: every vreg / store is a full 128 lanes.
        rows = _cdiv(max_len * d_model, _LANES)
        cols = _LANES
        scale, phase = _scale_phase_flat(d_model)
    else:
        # Natural layout: no post-kernel reshape / HBM relayout.
        rows = max_len
        cols = d_model
        scale, phase = _scale_phase_natural(d_model)

    col_block = _LANES if cols % _LANES == 0 else cols   # full-extent block if cols < 128
    n_col_blocks = cols // col_block

    rows_padded = _round_up(rows, _SUBLANES)
    block_rows = min(_BLOCK_ROWS_CAP, rows_padded)
    if n_col_blocks == 1 and rows_padded > _SUBLANES:
        # Keep >= 2 grid steps so v7x's two TensorCores both get a share of the build.
        block_rows = min(block_rows, _round_up(_cdiv(rows_padded, 2), _SUBLANES))
    rows_padded = _round_up(rows_padded, block_rows)
    grid = (rows_padded // block_rows, n_col_blocks)

    total_elems = rows_padded * cols
    out = pl.pallas_call(
        _pe_kernel,
        out_shape=jax.ShapeDtypeStruct((rows_padded, cols), jnp.float32),
        grid=grid,
        in_specs=[
            pl.BlockSpec((1, col_block), lambda i, j: (0, j)),   # scale row
            pl.BlockSpec((1, col_block), lambda i, j: (0, j)),   # phase row
        ],
        out_specs=pl.BlockSpec((block_rows, col_block), lambda i, j: (i, j)),
        compiler_params=pltpu.CompilerParams(
            dimension_semantics=("parallel", "parallel"),
        ),
        cost_estimate=pl.CostEstimate(
            flops=2 * total_elems,
            transcendentals=total_elems,
            bytes_accessed=4 * total_elems + 8 * cols,
        ),
    )(scale, phase)

    if flat_layout:
        total = max_len * d_model
        pe = out.reshape(-1)[:total].reshape(max_len, d_model)   # one-time relayout
    else:
        pe = out[:max_len] if rows_padded != max_len else out    # one-time row trim
    return pe[None]  # (1, max_len, d_model)


@functools.lru_cache(maxsize=None)
def _cached_pe_slice(d_model: int, max_len: int, seq_len: int) -> jnp.ndarray:
    """Caches pe[:, :seq_len] so steady-state forward() issues no device ops."""
    pe = make_positional_embedding_table(d_model, max_len)
    return pe if seq_len == max_len else pe[:, :seq_len, :]


def positional_embedding_forward(x: jnp.ndarray, d_model: int, max_len: int = 100) -> jnp.ndarray:
    """Equivalent of PositionalEmbedding.forward(x): returns pe[:, :x.shape[1]]."""
    return _cached_pe_slice(d_model, max_len, x.shape[1])        # (1, seq_len, d_model)


def _reference_pe(d_model: int, max_len: int = 100) -> jnp.ndarray:
    """Pure-JAX reference mirroring the PyTorch __init__ construction."""
    position = jnp.arange(0, max_len, dtype=jnp.float32)[:, None]
    div_term = jnp.exp(
        jnp.arange(0, d_model, 2, dtype=jnp.float32) * -(math.log(10000.0) / d_model)
    )
    pe = jnp.zeros((max_len, d_model), dtype=jnp.float32)
    pe = pe.at[:, 0::2].set(jnp.sin(position * div_term))
    pe = pe.at[:, 1::2].set(jnp.cos(position * div_term))
    return pe[None]


if __name__ == "__main__":
    d_model = 32
    max_len = 100
    batch, seq = 2, 8

    key = jax.random.PRNGKey(0)
    # x layout: (batch, seq, d_model); only its seq length matters for the forward.
    x = jax.random.normal(key, (batch, seq, d_model), dtype=jnp.float32)

    # Small-width path (flat lane-dense layout, 128 % d_model == 0).
    out = jax.block_until_ready(positional_embedding_forward(x, d_model=d_model, max_len=max_len))
    out2 = jax.block_until_ready(positional_embedding_forward(x, d_model=d_model, max_len=max_len))

    ref = _reference_pe(d_model, max_len)[:, :seq]
    assert out.shape == (1, seq, d_model), out.shape
    assert out.dtype == jnp.float32
    assert jnp.allclose(out, ref, atol=5e-5, rtol=1e-5), "mismatch vs reference (flat path)"
    assert jnp.array_equal(out, out2), "cached table mismatch"

    # Also exercise the natural-layout path (d_model multiple of 128, no reshape).
    d_big = 128
    x_big = jax.random.normal(key, (batch, seq, d_big), dtype=jnp.float32)
    out_big = jax.block_until_ready(
        positional_embedding_forward(x_big, d_model=d_big, max_len=max_len))
    ref_big = _reference_pe(d_big, max_len)[:, :seq]
    assert out_big.shape == (1, seq, d_big)
    assert jnp.allclose(out_big, ref_big, atol=5e-5, rtol=1e-5), "mismatch (natural path)"

    print("KERNEL_OK")
</pallas_src>

<mosaic_0001>
module attributes {stable_mosaic.version = 11 : i64} {
  func.func @_pe_kernel(%arg0: i32, %arg1: i32, %arg2: memref<1x128xf32, #tpu.memory_space<vmem>>, %arg3: memref<1x128xf32, #tpu.memory_space<vmem>>, %arg4: memref<16x128xf32, #tpu.memory_space<vmem>>) attributes {dimension_semantics = [#tpu.dimension_semantics<parallel>, #tpu.dimension_semantics<parallel>], iteration_bounds = array<i64: 2, 1>, scalar_prefetch = 0 : i64, scratch_operands = 0 : i64, tpu.core_type = #tpu.core_type<tc>, window_params = [{transform_indices = @transform_0, window_bounds = array<i64: 1, 128>}, {transform_indices = @transform_1, window_bounds = array<i64: 1, 128>}, {transform_indices = @transform_2, window_bounds = array<i64: 16, 128>}]} {
    %c16_i32 = arith.constant 16 : i32
    %0 = arith.muli %arg0, %c16_i32 : i32
    %1 = arith.sitofp %0 : i32 to f32
    %2 = tpu.iota {dimensions = array<i32: 0>} : vector<16x128xi32>
    %3 = arith.sitofp %2 : vector<16x128xi32> to vector<16x128xf32>
    %4 = vector.broadcast %1 : f32 to vector<16x128xf32>
    %5 = arith.addf %4, %3 : vector<16x128xf32>
    %c0 = arith.constant 0 : index
    %c0_0 = arith.constant 0 : index
    %6 = vector.load %arg2[%c0, %c0_0] : memref<1x128xf32, #tpu.memory_space<vmem>>, vector<1x128xf32>
    %7 = vector.broadcast %6 : vector<1x128xf32> to vector<16x128xf32>
    %8 = arith.mulf %5, %7 : vector<16x128xf32>
    %c0_1 = arith.constant 0 : index
    %c0_2 = arith.constant 0 : index
    %9 = vector.load %arg3[%c0_1, %c0_2] : memref<1x128xf32, #tpu.memory_space<vmem>>, vector<1x128xf32>
    %10 = vector.broadcast %9 : vector<1x128xf32> to vector<16x128xf32>
    %11 = arith.addf %8, %10 : vector<16x128xf32>
    %12 = math.sin %11 : vector<16x128xf32>
    %c0_3 = arith.constant 0 : index
    %c0_4 = arith.constant 0 : index
    %13 = vector.load %arg4[%c0_3, %c0_4] : memref<16x128xf32, #tpu.memory_space<vmem>>, vector<16x128xf32>
    tpu.vector_store %arg4[%c0_3, %c0_4], %12 {strides = array<i32>} : memref<16x128xf32, #tpu.memory_space<vmem>>, vector<16x128xf32>,
    return
  }
  func.func @transform_0(%arg0: i32, %arg1: i32) -> (i32, i32) {
    %c0_i32 = arith.constant 0 : i32
    %c0_i32_0 = arith.constant 0 : i32
    return %c0_i32, %arg1 : i32, i32
  }
  func.func @transform_1(%arg0: i32, %arg1: i32) -> (i32, i32) {
    %c0_i32 = arith.constant 0 : i32
    %c0_i32_0 = arith.constant 0 : i32
    return %c0_i32, %arg1 : i32, i32
  }
  func.func @transform_2(%arg0: i32, %arg1: i32) -> (i32, i32) {
    %c0_i32 = arith.constant 0 : i32
    return %arg0, %arg1 : i32, i32
  }
}

</mosaic_0001>

<bundles_post_ra>
// kernel: tpu_custom_call.1
= control target key start
LH: loop header
LB: loop body
LE: loop exit
PB: predicated region body
PF: predicated region fallthrough
CT: control target
= control target key end

     0   :  { %7 = vsyncpa [#allocation3], 0  ;;  %s994_s0 = inlined_call_operand.hbm [shape: f32[1,128], index: 0, kind: input, shape index: {}]   ;;  %s995_s1 = inlined_call_operand.vmem [shape: f32[1,128], index: 1, kind: input, shape index: {}]   ;;  %s996_s2 = inlined_call_operand.hbm [shape: f32[32,128], index: 2, kind: output, shape index: {}]  }
   0x1   :  { %8 = vsyncpa [#allocation4], 0 }
   0x2   :  { %10 = vsyncpa [#allocation4 + $0x1], 0  ;;  %s762_s9 = smov 0   ;;  %s764_s10 = smov 0  }
   0x3   :  { %s766_s11 = smov 0   ;;  %s768_s12 = smov 0  }
   0x4   :  { %s770_s13 = smov 0   ;;  %s772_s14 = smov 0  }
   0x5 LB: > { %s510_s15 = sadd.s32 4294967295, %s735_s14   ;;  %s511_s16 = sadd.s32 4294967294, %s735_s14   ;;  %s735_s14 = sphi %s772_s14, %s16_s14   ;;  %s731_s13 = sphi %s770_s13, %s1016_s13   ;;  %s727_s12 = sphi %s768_s12, %s1015_s12   ;;  %s723_s11 = sphi %s766_s11, %s1014_s11   ;;  %s719_s10 = sphi %s764_s10, %s1013_s10   ;;  %s715_s9 = sphi %s762_s9, %s1012_s9  }
   0x6   : > { %s28_s17 = sadd.s32 1, %s731_s13  ;;  %s89_s18 = sadd.s32 1, %s723_s11 }
   0x7   : > { %p30_p0 = scmp.ge.s32.totalorder %s28_s17, 2  ;;  %p99_p1 = scmp.ne.s32.totalorder %s723_s11, %s719_s10 }
   0x8   : > { %p100_p2 = scmp.eq.s32.totalorder %s510_s15, 1  ;;  %p105_p3 = scmp.ne.s32.totalorder %s719_s10, %s715_s9 }
   0x9   : > { %s1018_s17 = smov (%p30_p0, %s28_s17), 0  ;;  %p106_p5 = scmp.eq.s32.totalorder %s511_s16, 1 }
   0xa   : > { %p802_p4 = por %p100_p2, %p99_p1  ;;  %s84_s20 = ssub.s32 %s731_s13, %s1018_s17 }
   0xb   : > { %p512_p6 = scmp.ge.s32.totalorder %s735_s14, 1  ;;  %p87_p7 = scmp.eq.s32.totalorder %s84_s20, 0 }
   0xc   : > { %s1001_s19 = scalar_select %p802_p4, 1, 0 }
   0xd   : > { %p809_p8 = por %p106_p5, %p105_p3  ;;  %p113_p9 = scmp.lt.s32.totalorder %s735_s14, 3 }
   0xe   : > { %s815_s22 = scalar_select %p87_p7, %s723_s11, %s89_s18  }
   0xf   : > { %s1002_s21 = scalar_select %p809_p8, 1, 0 }
  0x10   : > { %p817_p10 = pnand %p512_p6, %p113_p9  ;;  %p821_p11 = scmp.eq.s32.totalorder %s510_s15, 0 }
  0x11   : > { %s737_s25 = smov [#allocation2]   ;;  %s625_s30 = scalar_lea.hbm %s994_s0, 16 }
  0x12   : > { %s1003_s23 = scalar_select %p817_p10, 1, 0 }
  0x13   : > { %s1004_s24 = scalar_select %p821_p11, 1, 0 }
  0x14   : > { %p549_p12 = pneg %p817_p10  ;;  %s128_s26 = sshll.u32 %s737_s25, 4  ;;  %s129_s26 = int_to_ptr.vmem [resolvable:$true] %s128_s26 }
  0x15   : > { %p626_p0 = scmp.ne.s32.totalorder %s994_s0, %s625_s30  ;;  %p632_p5 = scmp.lt.u32.totalorder %s625_s30, %s994_s0 }
  0x16   : > { %p829_p13 = pnand %p821_p11, %p549_p12 }
  0x18   : > { %p627_p1 = pneg %p829_p13 }
  0x1a   : > { %p628_p2 = pnand %p627_p1, %p626_p0 }
  0x1c   : > { %p629_p3 = pneg %p628_p2 }
  0x1e   : > { %p634_p6 = pnand %p632_p5, %p629_p3 }
  0x20   : > { %637 = shalt.err (!%p634_p6)
}
  0x21   : > { %s638_s7 = scalar_lea.vmem %s129_s26, 16  ;;  %s645_s8 = scalar_lea.vmem %s129_s26, 32 }
  0x22   : > { %p639_p7 = scmp.ne.s32.totalorder %s129_s26, %s638_s7  ;;  %p646_p8 = scmp.lt.s32.totalorder %s129_s26, %s129_s26 }
  0x23   : > { %p647_p4 = scmp.lt.s32.totalorder %s645_s8, %s638_s7 }
  0x24   : > { %p641_p9 = pnand %p639_p7, %p627_p1 }
  0x25   : > { %p648_p11 = por %p647_p4, %p646_p8 }
  0x26   : > { %p642_p12 = pneg %p641_p9 }
  0x28   : > { %p649_p10 = pnand %p648_p11, %p642_p12 }
  0x2a   : > { %652 = shalt.err (!%p649_p10)
}
  0x2b   : > { %552 = dma.hbm_to_vmem [thread:$0]  (!%p829_p13), %s994_s0, 16, %s129_s26, [#allocation3]  }
  0x2c   : > { %p1006_p0 = scmp.ne.s32.totalorder %s1003_s23, 0 }
  0x2d   : > { %p1007_p2 = scmp.ne.s32.totalorder (!%p1006_p0), %s1004_s24, 0 }
  0x2e   : > { %147 = sbr.rel (%p1006_p0) target bundleno = 171 (0xab), region = 28 }
  0x35   : > { %706 = dma.done.wait (%p1007_p2), [#allocation3], 16  }
  0x36   : > { %708 = vsyncadd (%p1007_p2), [#allocation3], 4294967280  ;;  %s518_s18 = sshll.u32 %s727_s12, 4  ;;  %v173_v0 = vlaneseq  ;;  %v519_v7 = vld [vmem:[#allocation2] ss:$0 sm:$0xff]  ;;  %s164_s24 = sand.u32 1, %s719_s10  }
  0x37   : > { %s172_s20 = scvt.s32.f32 %s518_s18  ;;  %v520_v8 = vld [vmem:[%s995_s1] ss:$0 sm:$0xff]  ;;  %v738_v33 = vmov 683565275   ;;  %v739_v35 = vmov 2475754826  }
  0x38   : > { %v174_v1 = vshrl.u32 %v173_v0, 7  ;;  %v740_v37 = vmov 2131351028   ;;  %v741_v39 = vmov 2102212464   ;;  %s517_s26 = sshll.u32 %s164_s24, 4 }
  0x39   : > { %v178_v2 = vstv %s172_s20  ;;  %v742_v41 = vmov 920167782   ;;  %v743_v48 = vmov 1326507024   ;;  %s166_s27 = scalar_lea.vmem [#allocation5], %s517_s26  ;;  %s534_s29 = sshll.u32 %s727_s12, 8 }
  0x3a   : > { %v176_v3 = vcvt.s32.f32 %v174_v1  ;;  %v175_v4 = vadd.s32 8, %v174_v1  ;;  %s424_s28 = sshll.u32 %s166_s27, 4  ;;  %s944_s4 = scalar_lea.hbm %s996_s2, %s534_s29  ;;  %s939_s28 = int_to_ptr.vmem [resolvable:$true] %s424_s28 }
  0x3b   : > { %s948_s12 = scalar_lea.sflag [#allocation4], %s164_s24  ;;  %s653_s5 = scalar_lea.vmem %s939_s28, 256 }
  0x3c   : > { %v179_v5 = vadd.f32 %v178_v2, %v176_v3  ;;  %v177_v6 = vcvt.s32.f32 %v175_v4  ;;  %p654_p4 = scmp.ne.s32.totalorder %s939_s28, %s653_s5  ;;  %p1010_p8 = scmp.ne.s32.totalorder %s1001_s19, 0 }
  0x3d   : > { %s744_s6 = smov [#allocation5]  }
  0x3e   : > { %v188_v9 = vmul.f32 %v519_v7, %v179_v5  ;;  %v180_v10 = vadd.f32 %v178_v2, %v177_v6  ;;  %p655_p10 = pnand %p654_p4, %p1010_p8  ;;  %s657_s7 = sshll.u32 %s744_s6, 4  ;;  %s658_s7 = int_to_ptr.vmem [resolvable:$false] %s657_s7 }
  0x3f   : > { %s659_s8 = scalar_lea.vmem %s658_s7, 512  ;;  %p660_p13 = scmp.lt.s32.totalorder %s939_s28, %s658_s7 }
  0x40   : > { %v859_v11 = vadd.f32 %v520_v8, %v188_v9  ;;  %v189_v12 = vmul.f32 %v519_v7, %v180_v10  ;;  %p656_p11 = pneg %p655_p10  ;;  %p661_p1 = scmp.lt.s32.totalorder %s659_s8, %s653_s5 }
  0x42   : > { %v199_v13 = vand.u32 2147483647, %v859_v11  ;;  %v202_v14 = vand.u32 2139095040, %v859_v11  ;;  %v863_v15 = vadd.f32 %v520_v8, %v189_v12  ;;  %vm201_vm14 = vcmp.lt.s32.totalorder %v859_v11, 0  ;;  %p662_p3 = por %p661_p1, %p660_p13 }
  0x44   : > { %v203_v16 = vshrl.u32 %v202_v14, 23  ;;  %v206_v17 = vand.u32 8388607, %v199_v13  ;;  %v303_v18 = vand.u32 2147483647, %v863_v15  ;;  %v306_v19 = vand.u32 2139095040, %v863_v15  ;;  %p663_p5 = pnand %p662_p3, %p656_p11 }
  0x45   : > { %vm200_vm15 = vcmp.le.f32.partialorder %v199_v13, 0.7853982 }
  0x46   : > { %v521_v20 = vadd.s32 4294967169, %v203_v16  ;;  %v307_v21 = vshrl.u32 %v306_v19, 23  ;;  %v207_v23 = vor.u32 8388608, %v206_v17  ;;  %v871_v25 = vand.u32 8388607, %v303_v18 }
  0x48   : > { %v209_v22 = vadd.s32 1, %v521_v20  ;;  %v525_v24 = vadd.s32 4294967169, %v307_v21  ;;  %v873_v30 = vshll.u32 %v207_v23, 8  ;;  %v311_v31 = vor.u32 8388608, %v871_v25 }
  0x4a   : > { %vm210_vm0 = vcmp.gt.s32.totalorder %v209_v22, 0  ;;  %v313_v27 = vadd.s32 1, %v525_v24 }
  0x4b   : > { %v211_v26 = vsel %vm210_vm0, %v209_v22, 0  ;;  %vm305_vm0 = vcmp.lt.s32.totalorder %v863_v15, 0 }
  0x4c   : > { %v212_v28 = vshrl.u32 %v211_v26, 5  ;;  %v213_v29 = vand.u32 31, %v211_v26  ;;  %vm314_vm1 = vcmp.gt.s32.totalorder %v313_v27, 0 }
  0x4d   : > { %v315_v53 = vsel %vm314_vm1, %v313_v27, 0  ;;  %vm924_vm1 = vcmp.le.f32.partialorder %v303_v18, 0.7853982 }
  0x4e   : > { %v214_v32 = vsub.s32 32, %v213_v29  ;;  %v216_v34 = vshll.u32 %v738_v33, %v213_v29  ;;  %v219_v36 = vshll.u32 %v739_v35, %v213_v29  ;;  %v222_v38 = vshll.u32 %v740_v37, %v213_v29 }
  0x4f   : > { %v225_v40 = vshll.u32 %v741_v39, %v213_v29  ;;  %v228_v42 = vshll.u32 %v742_v41, %v213_v29  ;;  %vm231_vm2 = vcmp.lt.s32.totalorder %v212_v28, 1  ;;  %vm232_vm3 = vcmp.lt.s32.totalorder %v212_v28, 2 }
  0x50   : > { %v215_v43 = vshrl.u32 %v738_v33, %v214_v32  ;;  %v217_v44 = vshrl.u32 %v739_v35, %v214_v32  ;;  %v220_v45 = vshrl.u32 %v740_v37, %v214_v32  ;;  %v223_v46 = vshrl.u32 %v741_v39, %v214_v32 }
  0x51   : > { %v226_v47 = vshrl.u32 %v742_v41, %v214_v32  ;;  %v229_v49 = vshrl.u32 %v743_v48, %v214_v32  ;;  %vm233_vm4 = vcmp.lt.s32.totalorder %v212_v28, 3  ;;  %vm234_vm5 = vcmp.lt.s32.totalorder %v212_v28, 4 }
  0x52   : > { %v218_v50 = vor.u32 %v217_v44, %v216_v34  ;;  %v221_v51 = vor.u32 %v220_v45, %v219_v36  ;;  %v224_v52 = vor.u32 %v223_v46, %v222_v38  ;;  %v316_v56 = vshrl.u32 %v315_v53, 5 }
  0x53   : > { %v227_v54 = vor.u32 %v226_v47, %v225_v40  ;;  %v230_v55 = vor.u32 %v229_v49, %v228_v42  ;;  %v317_v57 = vand.u32 31, %v315_v53 }
  0x54   : > { %v235_v58 = vsel %vm231_vm2, %v215_v43, %v218_v50  ;;  %v236_v59 = vsel %vm234_vm5, %v224_v52, 2102212464  ;;  %v239_v60 = vsel %vm231_vm2, %v218_v50, %v221_v51  ;;  %v243_v61 = vsel %vm231_vm2, %v221_v51, %v224_v52 }
  0x55   : > { %v237_v62 = vsel %vm233_vm4, %v221_v51, %v236_v59  ;;  %v240_v63 = vsel %vm234_vm5, %v227_v54, 920167782  ;;  %v244_v0 = vsel %vm234_vm5, %v230_v55, 1326507024  ;;  %v318_v1 = vsub.s32 32, %v317_v57 }
  0x56   : > { %v238_v2 = vsel %vm232_vm3, %v235_v58, %v237_v62  ;;  %v241_v3 = vsel %vm233_vm4, %v224_v52, %v240_v63  ;;  %v245_v4 = vsel %vm233_vm4, %v227_v54, %v244_v0  ;;  %v320_v5 = vshll.u32 %v738_v33, %v317_v57 }
  0x57   : > { %v242_v6 = vsel %vm232_vm3, %v239_v60, %v241_v3  ;;  %v246_v7 = vsel %vm232_vm3, %v243_v61, %v245_v4  ;;  %v254_v8 = vmul.u32 %v873_v30, %v238_v2  ;;  %v319_v9 = vshrl.u32 %v738_v33, %v318_v1 }
  0x58   : > { %v888_v10 = vmul.u32.u64.low %v873_v30, %v246_v7  ;;  %v889_v12 = vmul.u32.u64.high %v873_v30, %v246_v7, %v888_v10  ;;  %v892_v14 = vmul.u32.u64.low %v873_v30, %v242_v6  ;;  %v893_v16 = vmul.u32.u64.high %v873_v30, %v242_v6, %v892_v14 }
  0x59   : > { %v321_v17 = vshrl.u32 %v739_v35, %v318_v1  ;;  %v323_v19 = vshll.u32 %v739_v35, %v317_v57  ;;  %v324_v20 = vshrl.u32 %v740_v37, %v318_v1  ;;  %v326_v21 = vshll.u32 %v740_v37, %v317_v57 }
  0x5a   : > { %v327_v22 = vshrl.u32 %v741_v39, %v318_v1  ;;  %v329_v23 = vshll.u32 %v741_v39, %v317_v57  ;;  %v330_v24 = vshrl.u32 %v742_v41, %v318_v1  ;;  %v332_v26 = vshll.u32 %v742_v41, %v317_v57 }
  0x5b   : > { %v322_v27 = vor.u32 %v321_v17, %v320_v5  ;;  %v325_v28 = vor.u32 %v324_v20, %v323_v19  ;;  %v333_v29 = vshrl.u32 %v743_v48, %v318_v1  ;;  %vm335_vm6 = vcmp.lt.s32.totalorder %v316_v56, 1 }
  0x5c   : > { %vm256_vm7 = vc.u32 %v889_v12, %v892_v14  ;;  %v257_v32 = vadd.s32 1, %v893_v16  ;;  %v328_v33 = vor.u32 %v327_v22, %v326_v21  ;;  %v351_v30 = vshll.u32 %v311_v31, 8 }
  0x5d   : > { %v331_v34 = vor.u32 %v330_v24, %v329_v23  ;;  %v334_v35 = vor.u32 %v333_v29, %v332_v26  ;;  %vm336_vm8 = vcmp.lt.s32.totalorder %v316_v56, 2  ;;  %vm337_vm9 = vcmp.lt.s32.totalorder %v316_v56, 3 }
  0x5e   : > { %v258_v36 = vsel %vm256_vm7, %v257_v32, %v893_v16  ;;  %vm338_vm10 = vcmp.lt.s32.totalorder %v316_v56, 4  ;;  %v339_v37 = vsel %vm335_vm6, %v319_v9, %v322_v27  ;;  %v343_v38 = vsel %vm335_vm6, %v322_v27, %v325_v28 }
  0x5f   : > { %v259_v39 = vadd.s32 %v258_v36, %v254_v8  ;;  %v340_v40 = vsel %vm338_vm10, %v328_v33, 2102212464  ;;  %v344_v41 = vsel %vm338_vm10, %v331_v34, 920167782  ;;  %v347_v42 = vsel %vm335_vm6, %v325_v28, %v328_v33 }
  0x60   : > { %v341_v43 = vsel %vm337_vm9, %v325_v28, %v340_v40  ;;  %v345_v44 = vsel %vm337_vm9, %v328_v33, %v344_v41  ;;  %v348_v25 = vsel %vm338_vm10, %v334_v35, 1326507024  ;;  %v255_v3 = vadd.s32 %v892_v14, %v889_v12 }
  0x61   : > { %v260_v31 = vadd.s32 536870912, %v259_v39  ;;  %v346_v45 = vsel %vm336_vm8, %v343_v38, %v345_v44  ;;  %v349_v46 = vsel %vm337_vm9, %v331_v34, %v348_v25  ;;  %v342_v47 = vsel %vm336_vm8, %v339_v37, %v341_v43 }
  0x62   : > { %v350_v48 = vsel %vm336_vm8, %v347_v42, %v349_v46  ;;  %v906_v49 = vmul.u32.u64.low %v351_v30, %v346_v45  ;;  %v907_v50 = vmul.u32.u64.high %v351_v30, %v346_v45, %v906_v49  ;;  %v358_v55 = vmul.u32 %v351_v30, %v342_v47 }
  0x63   : > { %v261_v51 = vshrl.u32 %v260_v31, 30  ;;  %v909_v52 = vmul.u32.u64.low %v351_v30, %v350_v48  ;;  %v910_v53 = vmul.u32.u64.high %v351_v30, %v350_v48, %v909_v52  ;;  %vm291_vm5 = vweird.f32 %v859_v11 }
  0x64   : > { %v361_v57 = vadd.s32 1, %v907_v50  ;;  %vm395_vm9 = vweird.f32 %v863_v15 }
  0x65   : > { %v262_v54 = vshll.u32 %v261_v51, 30  ;;  %vm360_vm11 = vc.u32 %v910_v53, %v906_v49  ;;  %v285_v27 = vsub.s32 4, %v261_v51  ;;  %v359_v12 = vadd.s32 %v906_v49, %v910_v53 }
  0x66   : > { %v362_v59 = vsel %vm360_vm11, %v361_v57, %v907_v50 }
  0x67   : > { %v263_v58 = vsub.s32 %v259_v39, %v262_v54  ;;  %v363_v61 = vadd.s32 %v362_v59, %v358_v55  ;;  %v286_v34 = vsel %vm201_vm14, %v285_v27, %v261_v51 }
  0x68   : > { %v288_v39 = vsel %vm200_vm15, 0, %v286_v34 }
  0x69   : > { %v265_v60 = vsub.s32 0, %v263_v58  ;;  %v364_v62 = vadd.s32 536870912, %v363_v61  ;;  %v292_v44 = vadd.s32 3, %v288_v39 }
  0x6b   : > { %v522_v56 = vmin.u32 %v265_v60, %v263_v58  ;;  %v365_v0 = vshrl.u32 %v364_v62, 30  ;;  %v293_v45 = vand.u32 3, %v292_v44 }
  0x6d   : > { %v267_v63 = vclz %v522_v56  ;;  %v366_v2 = vshll.u32 %v365_v0, 30  ;;  %v389_v31 = vsub.s32 4, %v365_v0  ;;  %vm298_vm2 = vcmp.eq.s32.totalorder %v293_v45, 2 }
  0x6e   : > { %vm295_vm3 = vcmp.eq.s32.totalorder %v293_v45, 0  ;;  %vm294_vm4 = vcmp.lt.s32.totalorder %v293_v45, 2 }
  0x6f   : > { %v523_v1 = vadd.s32 4294967294, %v267_v63  ;;  %v367_v5 = vsub.s32 %v363_v61, %v366_v2  ;;  %v390_v48 = vsel %vm305_vm0, %v389_v31, %v365_v0 }
  0x70   : > { %v392_v52 = vsel %vm924_vm1, 0, %v390_v48 }
  0x71   : > { %vm524_vm12 = vcmp.lt.s32.totalorder %v523_v1, 0  ;;  %v369_v9 = vsub.s32 0, %v367_v5  ;;  %v396_v57 = vadd.s32 3, %v392_v52 }
  0x72   : > { %v270_v4 = vsel %vm524_vm12, 0, %v523_v1 }
  0x73   : > { %v271_v6 = vsub.s32 32, %v270_v4  ;;  %v272_v7 = vshll.u32 %v263_v58, %v270_v4  ;;  %v275_v8 = vsub.s32 4294967266, %v270_v4  ;;  %v526_v17 = vmin.u32 %v369_v9, %v367_v5 }
  0x74   : > { %v397_v61 = vand.u32 3, %v396_v57 }
  0x75   : > { %v273_v10 = vshrl.u32 %v255_v3, %v271_v6  ;;  %v276_v16 = vadd.s32 127, %v275_v8  ;;  %v371_v21 = vclz %v526_v17 }
  0x76   : > { %vm402_vm6 = vcmp.eq.s32.totalorder %v397_v61, 2  ;;  %vm399_vm7 = vcmp.eq.s32.totalorder %v397_v61, 0  ;;  %vm398_vm8 = vcmp.lt.s32.totalorder %v397_v61, 2 }
  0x77   : > { %v274_v19 = vor.u32 %v273_v10, %v272_v7  ;;  %v277_v20 = vshll.u32 %v276_v16, 23  ;;  %v527_v24 = vadd.s32 4294967294, %v371_v21 }
  0x79   : > { %v278_v22 = vor.u32 4788187, %v277_v20  ;;  %v281_v23 = vcvt.s32.f32 %v274_v19  ;;  %vm528_vm13 = vcmp.lt.s32.totalorder %v527_v24, 0 }
  0x7a   : > { %v374_v28 = vsel %vm528_vm13, 0, %v527_v24 }
  0x7b   : > { %v279_v26 = vand.u32 2147483647, %v278_v22  ;;  %v375_v29 = vsub.s32 32, %v374_v28  ;;  %v376_v32 = vshll.u32 %v367_v5, %v374_v28  ;;  %v379_v33 = vsub.s32 4294967266, %v374_v28 }
  0x7d   : > { %v282_v14 = vmul.f32 %v281_v23, %v279_v26  ;;  %v377_v35 = vshrl.u32 %v359_v12, %v375_v29  ;;  %v380_v36 = vadd.s32 127, %v379_v33 }
  0x7f   : > { %v283_v30 = vxor.u32 2147483648, %v282_v14  ;;  %v378_v40 = vor.u32 %v377_v35, %v376_v32  ;;  %v381_v41 = vshll.u32 %v380_v36, 23 }
  0x81   : > { %v284_v37 = vsel %vm201_vm14, %v283_v30, %v282_v14  ;;  %v382_v42 = vor.u32 4788187, %v381_v41  ;;  %v385_v43 = vcvt.s32.f32 %v378_v40 }
  0x82   : > { %v287_v38 = vsel %vm200_vm15, %v859_v11, %v284_v37 }
  0x83   : > { %617 = vcosq.f32 %v287_v38  ;;  %v383_v25 = vand.u32 2147483647, %v382_v42 }
  0x84   : > { %619 = vsinq.f32 %v287_v38 }
  0x85   : > { %v386_v13 = vmul.f32 %v385_v43, %v383_v25 }
  0x87   : > { %v387_v47 = vxor.u32 2147483648, %v386_v13 }
  0x89   : > { %v388_v49 = vsel %vm305_vm0, %v387_v47, %v386_v13 }
  0x8a   : > { %v391_v51 = vsel %vm924_vm1, %v863_v15, %v388_v49 }
  0x8b   : > { %621 = vcosq.f32 %v391_v51 }
  0x8c   : > { %623 = vsinq.f32 %v391_v51 }
  0x8d   : > { %v618_v50 = vpop.eup %617 }
  0x8e   : > { %v620_v53 = vpop.eup %619  ;;  %v299_v18 = vxor.u32 2147483648, %v618_v50 }
  0x8f   : > { %v296_v54 = vxor.u32 2147483648, %v620_v53 }
  0x90   : > { %v300_v55 = vsel %vm298_vm2, %v299_v18, %v620_v53 }
  0x91   : > { %v297_v58 = vsel %vm295_vm3, %v618_v50, %v296_v54 }
  0x92   : > { %v301_v59 = vsel %vm294_vm4, %v297_v58, %v300_v55 }
  0x93   : > { %v302_v60 = vsel %vm291_vm5, nan, %v301_v59 }
  0x94   : > { %407 = vst [vmem:[%s166_s27] sm:$0xff] %v302_v60 }
  0x95   : > { %v622_v56 = vpop.eup %621 }
  0x96   : > { %v624_v62 = vpop.eup %623  ;;  %v403_v63 = vxor.u32 2147483648, %v622_v56 }
  0x97   : > { %v400_v0 = vxor.u32 2147483648, %v624_v62 }
  0x98   : > { %v404_v11 = vsel %vm402_vm6, %v403_v63, %v624_v62 }
  0x99   : > { %v401_v1 = vsel %vm399_vm7, %v622_v56, %v400_v0 }
  0x9a   : > { %v405_v2 = vsel %vm398_vm8, %v401_v1, %v404_v11 }
  0x9b   : > { %v406_v3 = vsel %vm395_vm9, nan, %v405_v2 }
  0x9c   : > { %408 = vst [vmem:[%s166_s27 + $0x8] sm:$0xff] %v406_v3 }
  0x9d   : > { %666 = shalt.err (!%p663_p5)
}
  0x9e   : > { %s667_s15 = scalar_lea.hbm %s944_s4, 256  ;;  %s671_s20 = scalar_lea.hbm %s996_s2, 512 }
  0x9f   : > { %p668_p6 = scmp.ne.s32.totalorder %s944_s4, %s667_s15  ;;  %p672_p12 = scmp.lt.u32.totalorder %s944_s4, %s996_s2 }
  0xa0   : > { %p673_p0 = scmp.lt.u32.totalorder %s671_s20, %s667_s15  ;;  %p675_p4 = scmp.lt.u32.totalorder %s667_s15, %s944_s4 }
  0xa1   : > { %p669_p7 = pnand %p668_p6, %p1010_p8 }
  0xa2   : > { %p674_p2 = por %p673_p0, %p672_p12 }
  0xa3   : > { %p670_p9 = pneg %p669_p7 }
  0xa4   : > { %p676_p10 = por %p675_p4, %p674_p2 }
  0xa6   : > { %p677_p11 = pnand %p676_p10, %p670_p9 }
  0xa8   : > { %680 = shalt.err (!%p677_p11)
}
  0xa9   : > { %s745_s24 = smov 128   ;;  %s746_s26 = smov 8  }
  0xaa   : > { %547 = dma.vmem_to_hbm [thread:$0]  (%p1010_p8), %s939_s28, 256, %s944_s4, %s948_s12, %s745_s24, %s745_s24, %s746_s26  }
  0xab PF: > { %p559_p13 = scmp.ge.s32.totalorder %s735_s14, 2  ;;  %s439_s27 = sand.u32 1, %s715_s9  }
  0xac   : > { %p1011_p1 = scmp.ne.s32.totalorder %s1002_s21, 0  ;;  %s440_s29 = scalar_lea.sflag [#allocation4], %s439_s27 }
  0xae   : > { %p554_p3 = pnand %p559_p13, %p1011_p1 }
  0xb0   : > { %710 = dma.done.wait (!%p554_p3), %s440_s29, 256  }
  0xb1   : > { %712 = vsyncadd (!%p554_p3), %s440_s29, 4294967040  ;;  %s16_s14 = sadd.s32 1, %s735_s14   ;;  %s1012_s9 = smov %s719_s10 }
  0xb2   : > { %p13_p5 = scmp.ge.s32.totalorder %s16_s14, 4   ;;  %s1013_s10 = smov %s723_s11 }
  0xb3   : > { %s1014_s11 = smov %s815_s22  ;;  %s1015_s12 = smov %s731_s13 }
  0xb4   : > { %s1016_s13 = smov %s1018_s17  ;;  %15 = sbr.rel (!%p13_p5) target bundleno = 5 (0x5), region = 69 }
  0xbb   :  { %445 = vsyncpa [#allocation3], 1 }
  0xbc   :  { %447 = vsyncpa [#allocation3 + $0x1], 1 }
  0xbd   :  { %448 = vsyncpa [#allocation4], 1 }
  0xbe   :  { %450 = vsyncpa [#allocation4 + $0x1], 1 }

</bundles_post_ra>
